<compile_context>
chip_gen: v7x
topology: tpu7x:2x2x1
jax: 0.10.0
libtpu: 0.0.40
codegen_flags: <defaults>
</compile_context>

<pallas_src>
import jax
import jax.numpy as jnp
import numpy as np
from jax.experimental import pallas as pl
from jax.experimental.pallas import tpu as pltpu


def _round_up(n, m):
    return ((n + m - 1) // m) * m


def _choose_batch_tiling(B, target_tb=256):
    """Pick (padded batch, batch tile).  16-row granularity: bf16 sublane
    packing for the pm operand and the (8,128) rule for the f32 output."""
    Bp = _round_up(B, 16)
    tb = min(_round_up(target_tb, 16), Bp)
    # v7x megacore: prefer >= 2 grid steps so the "parallel" batch axis can be
    # sharded across both TensorCores (no effect on single-TC v5e/v6e).
    if Bp // tb < 2 and Bp >= 32:
        tb = _round_up(Bp // 2, 16)
    Bp = _round_up(Bp, tb)
    return Bp, tb


# ---------------------------------------------------------------------------
# Kernels
# ---------------------------------------------------------------------------

def _lp_net_a_fused_kernel(pm_ref, w_eff_ref, b_eff_ref, pred_ref):
    # pred = mean_patch @ (W_pe @ W_cls) + ((b_pe + cls) @ W_cls + b_cls)
    pred_ref[...] = (
        jnp.dot(pm_ref[...], w_eff_ref[...], preferred_element_type=jnp.float32)
        + b_eff_ref[...])


def _lp_net_a_two_mm_kernel(pm_ref, w_pe_ref, w_cls_ref, b_eff_ref, pred_ref):
    # Used when NC >> D (the W_pe@W_cls fold would inflate FLOPs).
    tok = jnp.dot(pm_ref[...], w_pe_ref[...],
                  preferred_element_type=jnp.float32)            # (tb, Dp) f32
    pred_ref[...] = (
        jnp.dot(tok.astype(jnp.bfloat16), w_cls_ref[...],
                preferred_element_type=jnp.float32)
        + b_eff_ref[...])


# ---------------------------------------------------------------------------
# Wrapper
# ---------------------------------------------------------------------------

def prepare_params(params, patch_dim):
    """One-time parameter prep: bias/weight folding, zero-padding, bf16 cast.
    Call once per parameter set, NOT per forward."""
    PD = patch_dim
    D = params["w_pe"].shape[1]
    NC = params["w_cls"].shape[1]
    PDp = _round_up(PD, 128)
    Dp = _round_up(D, 128)
    NCp = _round_up(NC, 128)

    # Fold every additive term through the classifier head (exact in f32):
    #   pred = (mean_patch @ W_pe + b_pe + cls) @ W_cls + b_cls
    #        = mean_patch @ W_pe @ W_cls + ((b_pe + cls) @ W_cls + b_cls)
    b_eff = ((params["b_pe"].astype(jnp.float32) + params["cls"].astype(jnp.float32))
             @ params["w_cls"].astype(jnp.float32)
             + params["b_cls"].astype(jnp.float32))                       # (1, NC)

    fused = PD * NC < PD * D + D * NC  # fold weights only when it saves FLOPs

    prepared = {
        "PD": PD, "D": D, "NC": NC, "PDp": PDp, "Dp": Dp, "NCp": NCp,
        "fused": fused,
        "b_eff": jnp.zeros((1, NCp), jnp.float32).at[:, :NC].set(b_eff),
    }
    if fused:
        w_eff = (params["w_pe"].astype(jnp.float32)
                 @ params["w_cls"].astype(jnp.float32))                    # (PD, NC)
        prepared["w_eff"] = jnp.zeros((PDp, NCp), jnp.bfloat16).at[:PD, :NC].set(
            w_eff.astype(jnp.bfloat16))
    else:
        prepared["w_pe"] = jnp.zeros((PDp, Dp), jnp.bfloat16).at[:PD, :D].set(
            params["w_pe"].astype(jnp.bfloat16))
        prepared["w_cls"] = jnp.zeros((Dp, NCp), jnp.bfloat16).at[:D, :NC].set(
            params["w_cls"].astype(jnp.bfloat16))
    return prepared


def lp_net_a_forward(x, prepared, patch=4, target_tb=256):
    """x: float32 NCHW [B, C, H, W]; returns logits [B, num_classes]."""
    B, C, H, W = x.shape
    ph = pw = patch
    PD = C * ph * pw
    assert PD == prepared["PD"], "prepared params do not match input patching"
    PDp, NCp, NC = prepared["PDp"], prepared["NCp"], prepared["NC"]

    Bp, tb = _choose_batch_tiling(B, target_tb)

    # Mean over the patch grid WITHOUT materializing (B, P, PD):
    # mean_P(unfold(x)) == mean over the (H/ph, W/pw) grid axes; the resulting
    # (B, C, ph, pw) block flattens to (B, PD) in the same (C, ph, pw) order.
    patch_mean = x.astype(jnp.float32).reshape(
        B, C, H // ph, ph, W // pw, pw).mean(axis=(2, 4)).reshape(B, PD)

    pm = jnp.zeros((Bp, PDp), jnp.bfloat16).at[:B, :PD].set(
        patch_mean.astype(jnp.bfloat16))

    grid = (Bp // tb,)
    resident = pl.Buffered(1)  # constant-index blocks: no double-buffering

    if prepared["fused"]:
        kernel = _lp_net_a_fused_kernel
        weight_args = (prepared["w_eff"],)
        weight_specs = [
            pl.BlockSpec((PDp, NCp), lambda i: (0, 0), pipeline_mode=resident),
        ]
        flops = 2 * Bp * PDp * NCp
        weight_bytes = PDp * NCp * 2
    else:
        Dp = prepared["Dp"]
        kernel = _lp_net_a_two_mm_kernel
        weight_args = (prepared["w_pe"], prepared["w_cls"])
        weight_specs = [
            pl.BlockSpec((PDp, Dp), lambda i: (0, 0), pipeline_mode=resident),
            pl.BlockSpec((Dp, NCp), lambda i: (0, 0), pipeline_mode=resident),
        ]
        flops = 2 * Bp * PDp * Dp + 2 * Bp * Dp * NCp
        weight_bytes = PDp * Dp * 2 + Dp * NCp * 2

    in_specs = (
        [pl.BlockSpec((tb, PDp), lambda i: (i, 0))]       # streamed mean patches
        + weight_specs                                    # resident weights
        + [pl.BlockSpec((1, NCp), lambda i: (0, 0), pipeline_mode=resident)]
    )

    # VMEM budget from the actual footprint (2x headroom), capped at 48 MiB so
    # the same config fits under v7x's 64 MiB physical / 32 MiB scoped default.
    vmem_needed = (2 * tb * PDp * 2          # pm double buffer (bf16)
                   + 2 * tb * NCp * 4        # out double buffer (f32)
                   + weight_bytes            # single-buffered weights (bf16)
                   + NCp * 4)                # single-buffered b_eff (f32)
    vmem_limit = int(min(max(2 * vmem_needed + (2 << 20), 4 << 20), 48 << 20))

    cost = pl.CostEstimate(
        flops=int(flops),
        transcendentals=0,
        bytes_accessed=int(Bp * PDp * 2 + weight_bytes + NCp * 4 + Bp * NCp * 4),
    )

    pred_pad = pl.pallas_call(
        kernel,
        out_shape=jax.ShapeDtypeStruct((Bp, NCp), jnp.float32),
        grid=grid,
        in_specs=in_specs,
        out_specs=pl.BlockSpec((tb, NCp), lambda i: (i, 0)),
        compiler_params=pltpu.CompilerParams(
            dimension_semantics=("parallel",),      # megacore / v7x 2-TC shard
            vmem_limit_bytes=vmem_limit),
        cost_estimate=cost,
    )(pm, *weight_args, prepared["b_eff"])

    return pred_pad[:B, :NC]


# ---------------------------------------------------------------------------
# Pure-JAX reference (identical stand-in semantics, all f32)
# ---------------------------------------------------------------------------

def lp_net_a_reference(x, params, patch=4):
    B, C, H, W = x.shape
    ph = pw = patch
    P = (H // ph) * (W // pw)
    PD = C * ph * pw
    patches = x.reshape(B, C, H // ph, ph, W // pw, pw)
    patches = patches.transpose(0, 2, 4, 1, 3, 5).reshape(B, P, PD)
    tokens = patches.astype(jnp.float32) @ params["w_pe"] + params["b_pe"]
    cls_feat = params["cls"] + jnp.mean(tokens, axis=1)
    return cls_feat @ params["w_cls"] + params["b_cls"]


def init_params(key, patch_dim, dim_in, num_classes):
    k1, k2, k3, k4, k5 = jax.random.split(key, 5)
    scale_pe = 1.0 / jnp.sqrt(jnp.float32(patch_dim))
    scale_cls = 1.0 / jnp.sqrt(jnp.float32(dim_in))
    return {
        "w_pe":  jax.random.normal(k1, (patch_dim, dim_in), jnp.float32) * scale_pe,
        "b_pe":  jax.random.normal(k2, (1, dim_in), jnp.float32) * 0.01,
        "cls":   jax.random.normal(k3, (1, dim_in), jnp.float32) * 0.02,
        "w_cls": jax.random.normal(k4, (dim_in, num_classes), jnp.float32) * scale_cls,
        "b_cls": jax.random.normal(k5, (1, num_classes), jnp.float32) * 0.01,
    }


if __name__ == "__main__":
    B, C, H, W = 2, 4, 16, 16
    PATCH = 4
    DIM_IN = 32        # feature dim of the (stand-in) visual encoder
    NUM_CLASSES = 10

    key = jax.random.PRNGKey(0)
    k_x, k_p = jax.random.split(key)
    x = jax.random.normal(k_x, (B, C, H, W), jnp.float32)
    params = init_params(k_p, C * PATCH * PATCH, DIM_IN, NUM_CLASSES)

    # Parameter padding / casting / folding happens ONCE, outside the forward.
    prepared = prepare_params(params, C * PATCH * PATCH)

    pred = lp_net_a_forward(x, prepared, patch=PATCH)
    pred = jax.block_until_ready(pred)
    assert pred.shape == (B, NUM_CLASSES) and pred.dtype == jnp.float32

    ref = lp_net_a_reference(x, params, patch=PATCH)
    assert np.allclose(np.asarray(pred), np.asarray(ref), atol=5e-2, rtol=5e-2)

    print("KERNEL_OK")
</pallas_src>

<mosaic_0001>
module attributes {stable_mosaic.version = 11 : i64} {
  func.func @_lp_net_a_fused_kernel(%arg0: i32, %arg1: memref<16x128xbf16, #tpu.memory_space<vmem>>, %arg2: memref<128x128xbf16, #tpu.memory_space<vmem>>, %arg3: memref<1x128xf32, #tpu.memory_space<vmem>>, %arg4: memref<16x128xf32, #tpu.memory_space<vmem>>) attributes {dimension_semantics = [#tpu.dimension_semantics<parallel>], iteration_bounds = array<i64: 1>, scalar_prefetch = 0 : i64, scratch_operands = 0 : i64, tpu.core_type = #tpu.core_type<tc>, window_params = [{transform_indices = @transform_0, window_bounds = array<i64: 16, 128>}, {pipeline_mode = #tpu.pipeline_mode<synchronous>, transform_indices = @transform_1, window_bounds = array<i64: 128, 128>}, {pipeline_mode = #tpu.pipeline_mode<synchronous>, transform_indices = @transform_2, window_bounds = array<i64: 1, 128>}, {transform_indices = @transform_3, window_bounds = array<i64: 16, 128>}]} {
    %c0 = arith.constant 0 : index
    %c0_0 = arith.constant 0 : index
    %0 = vector.load %arg1[%c0, %c0_0] : memref<16x128xbf16, #tpu.memory_space<vmem>>, vector<16x128xbf16>
    %c0_1 = arith.constant 0 : index
    %c0_2 = arith.constant 0 : index
    %1 = vector.load %arg2[%c0_1, %c0_2] : memref<128x128xbf16, #tpu.memory_space<vmem>>, vector<128x128xbf16>
    %cst = arith.constant dense<0.000000e+00> : vector<16x128xf32>
    %2 = tpu.matmul %0, %1, %cst {dimension_numbers = #tpu.dot_dimension_numbers<[1], [0], [0], [1], [0, 0, 1, 1], [], []>} : vector<16x128xbf16>, vector<128x128xbf16>, vector<16x128xf32> -> vector<16x128xf32>
    %c0_3 = arith.constant 0 : index
    %c0_4 = arith.constant 0 : index
    %3 = vector.load %arg3[%c0_3, %c0_4] : memref<1x128xf32, #tpu.memory_space<vmem>>, vector<1x128xf32>
    %4 = vector.broadcast %3 : vector<1x128xf32> to vector<16x128xf32>
    %5 = arith.addf %2, %4 : vector<16x128xf32>
    %c0_5 = arith.constant 0 : index
    %c0_6 = arith.constant 0 : index
    %6 = vector.load %arg4[%c0_5, %c0_6] : memref<16x128xf32, #tpu.memory_space<vmem>>, vector<16x128xf32>
    tpu.vector_store %arg4[%c0_5, %c0_6], %5 {strides = array<i32>} : memref<16x128xf32, #tpu.memory_space<vmem>>, vector<16x128xf32>,
    return
  }
  func.func @transform_0(%arg0: i32) -> (i32, i32) {
    %c0_i32 = arith.constant 0 : i32
    %c0_i32_0 = arith.constant 0 : i32
    return %arg0, %c0_i32 : i32, i32
  }
  func.func @transform_1(%arg0: i32) -> (i32, i32) {
    %c0_i32 = arith.constant 0 : i32
    %c0_i32_0 = arith.constant 0 : i32
    %c0_i32_1 = arith.constant 0 : i32
    return %c0_i32, %c0_i32_0 : i32, i32
  }
  func.func @transform_2(%arg0: i32) -> (i32, i32) {
    %c0_i32 = arith.constant 0 : i32
    %c0_i32_0 = arith.constant 0 : i32
    %c0_i32_1 = arith.constant 0 : i32
    return %c0_i32, %c0_i32_0 : i32, i32
  }
  func.func @transform_3(%arg0: i32) -> (i32, i32) {
    %c0_i32 = arith.constant 0 : i32
    %c0_i32_0 = arith.constant 0 : i32
    return %arg0, %c0_i32 : i32, i32
  }
}

</mosaic_0001>

<bundles_post_ra>
// kernel: tpu_custom_call.1
= control target key start
LH: loop header
LB: loop body
LE: loop exit
PB: predicated region body
PF: predicated region fallthrough
CT: control target
= control target key end

     0   :  { %8 = vsyncpa [#allocation3], 0  ;;  %s381_s0 = inlined_call_operand.hbm [shape: bf16[16,128], index: 0, kind: input, shape index: {}]   ;;  %s382_s1 = inlined_call_operand.hbm [shape: bf16[128,128], index: 1, kind: input, shape index: {}]   ;;  %s383_s2 = inlined_call_operand.vmem [shape: f32[1,128], index: 2, kind: input, shape index: {}]   ;;  %s384_s3 = inlined_call_operand.hbm [shape: f32[16,128], index: 3, kind: output, shape index: {}]  }
   0x1   :  { %9 = vsyncpa [#allocation6], 0 }
   0x2   :  { %10 = vsyncpa [#allocation4], 0  ;;  %s313_s12 = smov [#allocation2]   ;;  %s241_s16 = scalar_lea.hbm %s381_s0, 128 }
   0x3   :  { %s16_s13 = sshll.u32 %s313_s12, 4  ;;  %p242_p0 = scmp.ne.s32.totalorder %s381_s0, %s241_s16  ;;  %s17_s13 = int_to_ptr.vmem [resolvable:$true] %s16_s13 }
   0x4   :  { %p245_p1 = scmp.lt.u32.totalorder %s241_s16, %s381_s0 }
   0x6   :  { %p247_p2 = pnand %p245_p1, %p242_p0 }
   0x8   :  { %250 = shalt.err (!%p247_p2)
}
   0x9   :  { %s251_s21 = scalar_lea.vmem %s17_s13, 128  ;;  %p256_p4 = scmp.lt.s32.totalorder %s17_s13, %s17_s13 }
   0xa   :  { %p252_p3 = scmp.ne.s32.totalorder %s17_s13, %s251_s21  ;;  %p257_p5 = scmp.lt.s32.totalorder %s251_s21, %s251_s21 }
   0xc   :  { %p258_p6 = por %p257_p5, %p256_p4 }
   0xe   :  { %p259_p7 = pnand %p258_p6, %p252_p3 }
  0x10   :  { %262 = shalt.err (!%p259_p7)
}
  0x11   :  { %s314_s22 = smov 64   ;;  %s315_s23 = smov 4  }
  0x12   :  { %22 = dma.hbm_to_vmem [thread:$0]  %s381_s0, 128, %s17_s13, [#allocation3], %s314_s22, %s314_s22, %s315_s23  }
  0x13   :  { %s316_s26 = smov [#allocation5]   ;;  %s263_s30 = scalar_lea.hbm %s382_s1, 1024 }
  0x14   :  { %s28_s27 = sshll.u32 %s316_s26, 4  ;;  %p264_p8 = scmp.ne.s32.totalorder %s382_s1, %s263_s30  ;;  %s29_s27 = int_to_ptr.vmem [resolvable:$true] %s28_s27 }
  0x15   :  { %p267_p9 = scmp.lt.u32.totalorder %s263_s30, %s382_s1 }
  0x17   :  { %p269_p10 = pnand %p267_p9, %p264_p8 }
  0x19   :  { %272 = shalt.err (!%p269_p10)
}
  0x1a   :  { %s273_s8 = scalar_lea.vmem %s29_s27, 1024  ;;  %p278_p12 = scmp.lt.s32.totalorder %s29_s27, %s29_s27 }
  0x1b   :  { %p274_p11 = scmp.ne.s32.totalorder %s29_s27, %s273_s8  ;;  %p279_p13 = scmp.lt.s32.totalorder %s273_s8, %s273_s8 }
  0x1d   :  { %p280_p0 = por %p279_p13, %p278_p12 }
  0x1f   :  { %p281_p1 = pnand %p280_p0, %p274_p11 }
  0x21   :  { %284 = shalt.err (!%p281_p1)
}
  0x22   :  { %34 = dma.hbm_to_vmem [thread:$0]  %s382_s1, 1024, %s29_s27, [#allocation6], %s314_s22, %s314_s22, %s315_s23  }
  0x23   :  { %307 = dma.done.wait [#allocation3], 128  }
  0x24   :  { %308 = vsyncadd [#allocation3], 4294967168 }
  0x25   :  { %309 = dma.done.wait [#allocation6], 1024  }
  0x26   :  { %310 = vsyncadd [#allocation6], 4294966272  ;;  %v317_v0 = vmov 0.0   ;;  %vm318_vm0 = vmmov 0   ;;  %v232_v1 = vld [vmem:[#allocation5] sm:$0xff]   ;;  %v233_v2 = vld [vmem:[#allocation5 + $0x8] sm:$0xff]  }
  0x27   :  { %203 = vmatprep.subr.bf16.mxu0 %v317_v0  ;;  %219 = vmatprep.mubr.msk.bf16.mxu0 %vm318_vm0, %v317_v0  ;;  %v234_v3 = vld [vmem:[#allocation5 + $0x10] sm:$0xff]   ;;  %v235_v4 = vld [vmem:[#allocation5 + $0x18] sm:$0xff]   ;;  %v236_v5 = vld [vmem:[#allocation5 + $0x20] sm:$0xff]   ;;  %s319_s11 = smov [#allocation7]  }
  0x28   :  { %204 = vmatpush3.bf16.msra.mxu0 %v232_v1  ;;  %v237_v6 = vld [vmem:[#allocation5 + $0x28] sm:$0xff]   ;;  %v238_v7 = vld [vmem:[#allocation5 + $0x30] sm:$0xff]   ;;  %v239_v8 = vld [vmem:[#allocation5 + $0x38] sm:$0xff]   ;;  %s171_s12 = sshll.u32 %s319_s11, 4  ;;  %s172_s12 = int_to_ptr.vmem [resolvable:$true] %s171_s12 }
  0x29   :  { %205 = vmatprep.subr.bf16.mxu0 %v317_v0  ;;  %v240_v9 = vld [vmem:[#allocation2] sm:$0xff]   ;;  %s285_s13 = scalar_lea.vmem %s172_s12, 256  ;;  %p290_p3 = scmp.lt.s32.totalorder %s172_s12, %s172_s12 }
  0x2a   :  { %v184_v10 = vld [vmem:[%s383_s2] ss:$0 sm:$0xff]  ;;  %p286_p2 = scmp.ne.s32.totalorder %s172_s12, %s285_s13  ;;  %p291_p4 = scmp.lt.s32.totalorder %s285_s13, %s285_s13 }
  0x2c   :  { %206 = vmatpush3.bf16.msra.mxu0 %v233_v2  ;;  %p292_p5 = por %p291_p4, %p290_p3 }
  0x2d   :  { %207 = vmatprep.subr.bf16.mxu0 %v317_v0 }
  0x2e   :  { %p293_p6 = pnand %p292_p5, %p286_p2 }
  0x30   :  { %208 = vmatpush3.bf16.msra.mxu0 %v234_v3 }
  0x31   :  { %209 = vmatprep.subr.bf16.mxu0 %v317_v0 }
  0x34   :  { %210 = vmatpush3.bf16.msra.mxu0 %v235_v4 }
  0x35   :  { %211 = vmatprep.subr.bf16.mxu0 %v317_v0 }
  0x38   :  { %212 = vmatpush3.bf16.msra.mxu0 %v236_v5 }
  0x39   :  { %213 = vmatprep.subr.bf16.mxu0 %v317_v0 }
  0x3c   :  { %214 = vmatpush3.bf16.msra.mxu0 %v237_v6 }
  0x3d   :  { %215 = vmatprep.subr.bf16.mxu0 %v317_v0 }
  0x40   :  { %216 = vmatpush3.bf16.msra.mxu0 %v238_v7 }
  0x41   :  { %217 = vmatprep.subr.bf16.mxu0 %v317_v0 }
  0x44   :  { %218 = vmatpush3.bf16.msra.mxu0 %v239_v8 }
  0x47   :  { %220 = vmatmul.mubr.bf16.vlgmr.msra.gmra.mrb[0].mxu0 %v240_v9 }
 0x11a   :  { %v157_v11 = vpop.f32.mrb[0].mxu0 }
 0x11b   :  { %v158_v12 = vadd.f32 %v184_v10, %v157_v11  ;;  %v221_v13 = vpop.f32.mrb[1].mxu0 }
 0x11c   :  { %v160_v14 = vpop.f32.mrb[2].mxu0 }
 0x11d   :  { %164 = vst [vmem:[#allocation7] sm:$0xff] %v158_v12  ;;  %v161_v15 = vadd.f32 %v184_v10, %v160_v14  ;;  %v222_v16 = vpop.f32.mrb[3].mxu0 }
 0x11f   :  { %165 = vst [vmem:[#allocation7 + $0x8] sm:$0xff] %v161_v15 }
 0x120   :  { %296 = shalt.err (!%p293_p6)
}
 0x121   :  { %s297_s15 = scalar_lea.hbm %s384_s3, 256 }
 0x122   :  { %p298_p7 = scmp.ne.s32.totalorder %s384_s3, %s297_s15  ;;  %p301_p8 = scmp.lt.u32.totalorder %s297_s15, %s384_s3 }
 0x124   :  { %p303_p9 = pnand %p301_p8, %p298_p7 }
 0x126   :  { %306 = shalt.err (!%p303_p9)
}
 0x127   :  { %s320_s20 = smov 128   ;;  %s321_s21 = smov 8  }
 0x128   :  { %177 = dma.vmem_to_hbm [thread:$0]  %s172_s12, 256, %s384_s3, [#allocation4], %s320_s20, %s320_s20, %s321_s21  }
 0x129   :  { %311 = dma.done.wait [#allocation4], 256  }
 0x12a   :  { %312 = vsyncadd [#allocation4], 4294967040 }
 0x12b   :  { %181 = vsyncpa [#allocation3], 1 }
 0x12c   :  { %182 = vsyncpa [#allocation6], 1 }
 0x12d   :  { %183 = vsyncpa [#allocation4], 1 }

</bundles_post_ra>
